<compile_context>
chip_gen: v7x
topology: tpu7x:2x2x1
jax: 0.10.0
libtpu: 0.0.40
codegen_flags: <defaults>
</compile_context>

<pallas_src>
import functools

import jax
import jax.numpy as jnp
from jax import lax
from jax.experimental import pallas as pl
from jax.experimental.pallas import tpu as pltpu


def _op_sequential_kernel(x_ref, w1t_ref, b1_ref, w2t_ref, b2_ref, o_ref,
                          *, chunk, lane_aligned):
    # x_ref:   (Cin,  T)   -- spatial axis on lanes (lane-dense)
    # w1t_ref: (Cmid, Cin) -- PyTorch conv1 weight (Cmid, Cin, 1, 1) squeezed
    # b1_ref:  (Cmid, 1)
    # w2t_ref: (Cout, Cmid)
    # b2_ref:  (Cout, 1)
    # o_ref:   (Cout, T)
    w1t = w1t_ref[...]
    b1 = b1_ref[...]
    w2t = w2t_ref[...]
    b2 = b2_ref[...]
    tile = x_ref.shape[-1]
    n_chunks = tile // chunk

    def process(off):
        x = x_ref[:, pl.ds(off, chunk)]                                  # (Cin, chunk)
        # op 1: Conv2d(Cin, Cmid, 1) on the MXU (idle otherwise), f32 accumulation.
        # op 2: None -> dropped by OpSequential.__init__
        # op 3: ReLU (bias folded in)
        h = jnp.maximum(
            jnp.dot(w1t, x, preferred_element_type=jnp.float32) + b1, 0.0)   # (Cmid, chunk)
        # op 4: Conv2d(Cmid, Cout, 1) on the MXU, lane-dense result.
        y = jnp.dot(w2t, h, preferred_element_type=jnp.float32) + b2         # (Cout, chunk)
        o_ref[:, pl.ds(off, chunk)] = y.astype(o_ref.dtype)

    if n_chunks <= 1:
        process(0)
    else:
        def body(j, carry):
            off = j * chunk
            if lane_aligned:
                off = pl.multiple_of(off, 128)
            process(off)
            return carry
        # Partial unroll gives the LLO scheduler visibility without blowing up code size.
        lax.fori_loop(0, n_chunks, body, 0, unroll=min(n_chunks, 8))


def _pick_tile_hw(hw: int, n: int, cap: int = 32768) -> int:
    """Lane tile: full H*W if it fits, else a 32K lane-dense tile (final block masked)."""
    if hw <= cap:
        tile = hw
        # v7x has 2 TensorCores: guarantee >= 2 grid steps when N == 1 so both get work.
        if n == 1 and hw >= 256:
            tile = (((hw + 1) // 2) + 127) // 128 * 128   # ~half, rounded up to 128 lanes
        return tile
    return cap  # multiple of 128; ragged tail handled by Pallas block masking


def _pick_chunk(tile: int, target: int = 512) -> int:
    """Strip-mine chunk: keep per-chunk intermediates in vregs (~40 vregs at 512 lanes)."""
    if tile <= 2 * target:
        return tile
    c = target
    while c >= 128:
        if tile % c == 0:
            return c
        c -= 128
    return tile  # no nice divisor: single pass (correct, just spills a little)


def op_sequential_forward(x_nchw, w1t, b1, w2t, b2, *, tile_hw=None):
    """Fused OpSequential([Conv1x1(Cin->Cmid), None, ReLU, Conv1x1(Cmid->Cout)]).

    x_nchw: (N, Cin, H, W) float32
    w1t:    (Cmid, Cin)   (PyTorch conv1 weight (Cmid, Cin, 1, 1) squeezed)
    b1:     (Cmid, 1)
    w2t:    (Cout, Cmid)  (PyTorch conv2 weight (Cout, Cmid, 1, 1) squeezed)
    b2:     (Cout, 1)
    returns (N, Cout, H, W)
    """
    N, Cin, H, W = x_nchw.shape
    Cmid = w1t.shape[0]
    Cout = w2t.shape[0]
    HW = H * W

    if tile_hw is None:
        tile_hw = _pick_tile_hw(HW, N)
    assert tile_hw == HW or tile_hw % 128 == 0, "tile_hw must be H*W or a multiple of 128"
    chunk = _pick_chunk(tile_hw)
    lane_aligned = (chunk % 128 == 0)

    # NCHW is already channel-major with contiguous spatial -> free reshape, no transpose.
    x_view = x_nchw.reshape(N, Cin, HW)

    grid = (N, pl.cdiv(HW, tile_hw))
    M = N * HW
    cost = pl.CostEstimate(
        flops=2 * M * (Cin * Cmid + Cmid * Cout),
        transcendentals=0,
        bytes_accessed=4 * (M * (Cin + Cout) + Cmid * Cin + Cout * Cmid + Cmid + Cout),
    )

    kernel = functools.partial(_op_sequential_kernel, chunk=chunk, lane_aligned=lane_aligned)

    out = pl.pallas_call(
        kernel,
        out_shape=jax.ShapeDtypeStruct((N, Cout, HW), x_nchw.dtype),
        grid_spec=pltpu.PrefetchScalarGridSpec(
            num_scalar_prefetch=0,
            grid=grid,
            in_specs=[
                # x tile: batch dim squeezed, (Cin, tile_hw) with HW on lanes.
                # TODO(synk): on v5e, if the profile shows the x DMA exposed, add
                # pipeline_mode=pl.Buffered(3) here.
                pl.BlockSpec((None, Cin, tile_hw), lambda n, t: (n, 0, t)),
                # Weights/biases: full resident blocks, constant index_map (no per-step DMA).
                pl.BlockSpec((Cmid, Cin), lambda n, t: (0, 0)),
                pl.BlockSpec((Cmid, 1), lambda n, t: (0, 0)),
                pl.BlockSpec((Cout, Cmid), lambda n, t: (0, 0)),
                pl.BlockSpec((Cout, 1), lambda n, t: (0, 0)),
            ],
            out_specs=pl.BlockSpec((None, Cout, tile_hw), lambda n, t: (n, 0, t)),
        ),
        compiler_params=pltpu.CompilerParams(
            # Both grid axes are independent -> megacore sharding on v7x (2 TCs/chip);
            # near-neutral on v5e/v6e.  I/O double buffers at the 32768-lane cap are
            # ~3 MiB, well under the default scoped VMEM limit on every generation
            # (incl. v7x's 64 MiB physical / 32 MiB scoped).
            dimension_semantics=("parallel", "parallel"),
        ),
        cost_estimate=cost,
    )(x_view, w1t, b1, w2t, b2)

    # (N, Cout, HW) -> (N, Cout, H, W): free reshape, no transpose.
    return out.reshape(N, Cout, H, W)


def _reference_forward(x_nchw, w1t, b1, w2t, b2):
    N, Cin, H, W = x_nchw.shape
    Cout = w2t.shape[0]
    x = x_nchw.reshape(N, Cin, H * W).astype(jnp.float32)
    h = jnp.maximum(jnp.einsum("mc,ncp->nmp", w1t, x) + b1, 0.0)
    y = jnp.einsum("om,nmp->nop", w2t, h) + b2
    return y.reshape(N, Cout, H, W).astype(x_nchw.dtype)


if __name__ == "__main__":
    key = jax.random.PRNGKey(0)
    k_x, k_w1, k_b1, k_w2, k_b2 = jax.random.split(key, 5)

    N, Cin, H, W = 2, 4, 16, 16
    Cmid, Cout = 32, 8

    x = jax.random.normal(k_x, (N, Cin, H, W), dtype=jnp.float32)
    # Deterministic parameter init (synthetic; no checkpoint load).
    # Stored already in the transposed-conv layout: (Cout_of_layer, Cin_of_layer).
    w1t = jax.random.normal(k_w1, (Cmid, Cin), dtype=jnp.float32) * 0.1
    b1 = jax.random.normal(k_b1, (Cmid, 1), dtype=jnp.float32) * 0.1
    w2t = jax.random.normal(k_w2, (Cout, Cmid), dtype=jnp.float32) * 0.1
    b2 = jax.random.normal(k_b2, (Cout, 1), dtype=jnp.float32) * 0.1

    out = op_sequential_forward(x, w1t, b1, w2t, b2)
    out = jax.block_until_ready(out)

    ref = _reference_forward(x, w1t, b1, w2t, b2)
    assert out.shape == (N, Cout, H, W)
    assert jnp.allclose(out, ref, atol=1e-5, rtol=1e-5)

    print("KERNEL_OK")
</pallas_src>

<mosaic_0001>
module attributes {stable_mosaic.version = 11 : i64} {
  func.func @_op_sequential_kernel(%arg0: i32, %arg1: i32, %arg2: memref<1x4x256xf32, #tpu.memory_space<vmem>>, %arg3: memref<32x4xf32, #tpu.memory_space<vmem>>, %arg4: memref<32x1xf32, #tpu.memory_space<vmem>>, %arg5: memref<8x32xf32, #tpu.memory_space<vmem>>, %arg6: memref<8x1xf32, #tpu.memory_space<vmem>>, %arg7: memref<1x8x256xf32, #tpu.memory_space<vmem>>) attributes {dimension_semantics = [#tpu.dimension_semantics<parallel>, #tpu.dimension_semantics<parallel>], iteration_bounds = array<i64: 2, 1>, scalar_prefetch = 0 : i64, scratch_operands = 0 : i64, tpu.core_type = #tpu.core_type<tc>, window_params = [{transform_indices = @transform_0, window_bounds = array<i64: 1, 4, 256>}, {pipeline_mode = #tpu.pipeline_mode<synchronous>, transform_indices = @transform_1, window_bounds = array<i64: 32, 4>}, {pipeline_mode = #tpu.pipeline_mode<synchronous>, transform_indices = @transform_2, window_bounds = array<i64: 32, 1>}, {pipeline_mode = #tpu.pipeline_mode<synchronous>, transform_indices = @transform_3, window_bounds = array<i64: 8, 32>}, {pipeline_mode = #tpu.pipeline_mode<synchronous>, transform_indices = @transform_4, window_bounds = array<i64: 8, 1>}, {transform_indices = @transform_5, window_bounds = array<i64: 1, 8, 256>}]} {
    %c0 = arith.constant 0 : index
    %c0_0 = arith.constant 0 : index
    %0 = vector.load %arg3[%c0, %c0_0] : memref<32x4xf32, #tpu.memory_space<vmem>>, vector<32x4xf32>
    %c0_1 = arith.constant 0 : index
    %c0_2 = arith.constant 0 : index
    %1 = vector.load %arg4[%c0_1, %c0_2] : memref<32x1xf32, #tpu.memory_space<vmem>>, vector<32x1xf32>
    %c0_3 = arith.constant 0 : index
    %c0_4 = arith.constant 0 : index
    %2 = vector.load %arg5[%c0_3, %c0_4] : memref<8x32xf32, #tpu.memory_space<vmem>>, vector<8x32xf32>
    %c0_5 = arith.constant 0 : index
    %c0_6 = arith.constant 0 : index
    %3 = vector.load %arg6[%c0_5, %c0_6] : memref<8x1xf32, #tpu.memory_space<vmem>>, vector<8x1xf32>
    %c0_7 = arith.constant 0 : index
    %c0_8 = arith.constant 0 : index
    %c0_9 = arith.constant 0 : index
    %4 = vector.load %arg2[%c0_7, %c0_8, %c0_9] : memref<1x4x256xf32, #tpu.memory_space<vmem>>, vector<1x4x256xf32>
    %5 = vector.shape_cast %4 : vector<1x4x256xf32> to vector<4x256xf32>
    %cst = arith.constant dense<0.000000e+00> : vector<32x256xf32>
    %6 = tpu.matmul %0, %5, %cst {dimension_numbers = #tpu.dot_dimension_numbers<[1], [0], [0], [1], [0, 0, 1, 1], [], []>} : vector<32x4xf32>, vector<4x256xf32>, vector<32x256xf32> -> vector<32x256xf32>
    %7 = vector.broadcast %1 : vector<32x1xf32> to vector<32x256xf32>
    %8 = arith.addf %6, %7 : vector<32x256xf32>
    %cst_10 = arith.constant 0.000000e+00 : f32
    %9 = vector.broadcast %cst_10 : f32 to vector<32x256xf32>
    %10 = arith.maximumf %8, %9 : vector<32x256xf32>
    %cst_11 = arith.constant dense<0.000000e+00> : vector<8x256xf32>
    %11 = tpu.matmul %2, %10, %cst_11 {dimension_numbers = #tpu.dot_dimension_numbers<[1], [0], [0], [1], [0, 0, 1, 1], [], []>} : vector<8x32xf32>, vector<32x256xf32>, vector<8x256xf32> -> vector<8x256xf32>
    %12 = vector.broadcast %3 : vector<8x1xf32> to vector<8x256xf32>
    %13 = arith.addf %11, %12 : vector<8x256xf32>
    %c0_12 = arith.constant 0 : index
    %c0_13 = arith.constant 0 : index
    %c0_14 = arith.constant 0 : index
    %14 = vector.load %arg7[%c0_12, %c0_13, %c0_14] : memref<1x8x256xf32, #tpu.memory_space<vmem>>, vector<1x8x256xf32>
    %15 = vector.shape_cast %14 : vector<1x8x256xf32> to vector<8x256xf32>
    %16 = vector.shape_cast %13 : vector<8x256xf32> to vector<1x8x256xf32>
    tpu.vector_store %arg7[%c0_12, %c0_13, %c0_14], %16 {strides = array<i32>} : memref<1x8x256xf32, #tpu.memory_space<vmem>>, vector<1x8x256xf32>,
    return
  }
  func.func @transform_0(%arg0: i32, %arg1: i32) -> (i32, i32, i32) {
    %c0_i32 = arith.constant 0 : i32
    %c0_i32_0 = arith.constant 0 : i32
    return %arg0, %c0_i32, %arg1 : i32, i32, i32
  }
  func.func @transform_1(%arg0: i32, %arg1: i32) -> (i32, i32) {
    %c0_i32 = arith.constant 0 : i32
    %c0_i32_0 = arith.constant 0 : i32
    %c0_i32_1 = arith.constant 0 : i32
    return %c0_i32, %c0_i32_0 : i32, i32
  }
  func.func @transform_2(%arg0: i32, %arg1: i32) -> (i32, i32) {
    %c0_i32 = arith.constant 0 : i32
    %c0_i32_0 = arith.constant 0 : i32
    %c0_i32_1 = arith.constant 0 : i32
    return %c0_i32, %c0_i32_0 : i32, i32
  }
  func.func @transform_3(%arg0: i32, %arg1: i32) -> (i32, i32) {
    %c0_i32 = arith.constant 0 : i32
    %c0_i32_0 = arith.constant 0 : i32
    %c0_i32_1 = arith.constant 0 : i32
    return %c0_i32, %c0_i32_0 : i32, i32
  }
  func.func @transform_4(%arg0: i32, %arg1: i32) -> (i32, i32) {
    %c0_i32 = arith.constant 0 : i32
    %c0_i32_0 = arith.constant 0 : i32
    %c0_i32_1 = arith.constant 0 : i32
    return %c0_i32, %c0_i32_0 : i32, i32
  }
  func.func @transform_5(%arg0: i32, %arg1: i32) -> (i32, i32, i32) {
    %c0_i32 = arith.constant 0 : i32
    %c0_i32_0 = arith.constant 0 : i32
    return %arg0, %c0_i32, %arg1 : i32, i32, i32
  }
}

</mosaic_0001>

<bundles_post_ra>
// kernel: tpu_custom_call.1
= control target key start
LH: loop header
LB: loop body
LE: loop exit
PB: predicated region body
PF: predicated region fallthrough
CT: control target
= control target key end

     0   :  { %10 = vsyncpa [#allocation3], 0  ;;  %s922_s0 = inlined_call_operand.vmem [shape: f32[2,4,256], index: 0, kind: input, shape index: {}]   ;;  %s923_s1 = inlined_call_operand.vmem [shape: f32[32,4], index: 1, kind: input, shape index: {}]   ;;  %s924_s2 = inlined_call_operand.vmem [shape: f32[32,1], index: 2, kind: input, shape index: {}]   ;;  %s925_s3 = inlined_call_operand.vmem [shape: f32[8,32], index: 3, kind: input, shape index: {}]   ;;  %s926_s4 = inlined_call_operand.vmem [shape: f32[8,1], index: 4, kind: input, shape index: {}]   ;;  %s927_s5 = inlined_call_operand.hbm [shape: f32[2,8,256], index: 5, kind: output, shape index: {}]  }
   0x1   :  { %12 = vsyncpa [#allocation3 + $0x1], 0  ;;  %s780_s18 = smov 0   ;;  %s782_s19 = smov 0  }
   0x2   :  { %s784_s20 = smov 0   ;;  %s786_s21 = smov 0  }
   0x3   :  { %s788_s22 = smov 0   ;;  %s790_s23 = smov 0  }
   0x4 LB: > { %s577_s24 = sadd.s32 4294967295, %s745_s23   ;;  %s578_s25 = sadd.s32 4294967294, %s745_s23   ;;  %s745_s23 = sphi %s790_s23, %s18_s23   ;;  %s741_s22 = sphi %s788_s22, %s934_s22   ;;  %s737_s21 = sphi %s786_s21, %s933_s21   ;;  %s733_s20 = sphi %s784_s20, %s932_s20   ;;  %s729_s19 = sphi %s782_s19, %s931_s19   ;;  %s725_s18 = sphi %s780_s18, %s930_s18  }
   0x5   : > { %s30_s26 = sadd.s32 1, %s741_s22  ;;  %s151_s27 = sadd.s32 1, %s733_s20 }
   0x6   : > { %p32_p0 = scmp.ge.s32.totalorder %s30_s26, 2  ;;  %p161_p1 = scmp.ne.s32.totalorder %s733_s20, %s729_s19 }
   0x7   : > { %p162_p2 = scmp.eq.s32.totalorder %s577_s24, 1  ;;  %p167_p3 = scmp.ne.s32.totalorder %s729_s19, %s725_s18 }
   0x8   : > { %s936_s26 = smov (%p32_p0, %s30_s26), 0  ;;  %p168_p5 = scmp.eq.s32.totalorder %s578_s25, 1 }
   0x9   : > { %p820_p4 = por %p162_p2, %p161_p1  ;;  %s146_s29 = ssub.s32 %s741_s22, %s936_s26 }
   0xa   : > { %p581_p6 = scmp.ge.s32.totalorder %s745_s23, 1  ;;  %p149_p7 = scmp.eq.s32.totalorder %s146_s29, 0 }
   0xb   : > { %p827_p8 = por %p168_p5, %p167_p3  ;;  %p211_p9 = scmp.lt.s32.totalorder %s745_s23, 3 }
   0xc   : > { %s833_s6 = scalar_select %p149_p7, %s733_s20, %s151_s27  }
   0xd   : > { %p212_p10 = pnand %p581_p6, %p211_p9 }
   0xe   : > { %p244_p11 = scmp.lt.s32.totalorder (!%p212_p10), %s737_s21, 1  ;;  %v747_v0 = vmov (!%p212_p10), 0.0   ;;  %v258_v1 = vld [vmem:[%s924_s2] sm:$0xff] (!%p212_p10)  ;;  %v748_v2 = vmov (!%p212_p10), 0   ;;  %v260_v3 = vld [vmem:[%s924_s2 + $0x10] sm:$0xff] (!%p212_p10)  ;;  %v259_v4 = vld [vmem:[%s924_s2 + $0x8] sm:$0xff] (!%p212_p10) }
   0xf   : > { %215 = sbr.rel (%p212_p10) target bundleno = 495 (0x1ef), region = 40  ;;  %369 = vmatprep.mubr.f32.mxu0 (!%p212_p10), %v747_v0  ;;  %475 = vmatprep.mubr.f32.mxu1 (!%p212_p10), %v747_v0  ;;  %v261_v5 = vld [vmem:[%s924_s2 + $0x18] sm:$0xff] (!%p212_p10)  ;;  %vm300_vm0 = vcmask (!%p212_p10), 1043456   ;;  %v254_v8 = vld [vmem:[%s923_s1] sm:$0xff] (!%p212_p10)  ;;  %vm287_vm1 = vcmask (!%p212_p10), 31744   ;;  %v255_v10 = vld [vmem:[%s923_s1 + $0x8] sm:$0xff] (!%p212_p10) }
  0x10   : > { %664 = vset.pattern.permute.xlu0 (!%p212_p10), %v748_v2  ;;  %665 = vset.pattern.permute.xlu1 (!%p212_p10), %v748_v2  ;;  %v263_v9 = vld [vmem:[%s926_s4] sm:$0xff] (!%p212_p10)  ;;  %v256_v11 = vld [vmem:[%s923_s1 + $0x10] sm:$0xff] (!%p212_p10)  ;;  %v257_v12 = vld [vmem:[%s923_s1 + $0x18] sm:$0xff] (!%p212_p10)  ;;  %vm407_vm2 = vcmask (!%p212_p10), 261120   ;;  %s240_s17 = sand.u32 (!%p212_p10), 1, %s729_s19   ;;  %s749_s11 = smov (!%p212_p10), [#allocation2]  }
  0x11   : > { %267 = vperm.xlu0 (!%p212_p10), %664, %v258_v1   ;;  %277 = vperm.xlu1 (!%p212_p10), %665, %v260_v3   ;;  %v262_v45 = vld [vmem:[%s925_s3] sm:$0xff] (!%p212_p10)  ;;  %s582_s24 = sshll.u32 (!%p212_p10), %s240_s17, 4 }
  0x12   : > { %s242_s27 = scalar_lea.vmem (!%p212_p10), [#allocation2], %s582_s24 }
  0x13   : > { %s501_s29 = sshll.u32 (!%p212_p10), %s242_s27, 4  ;;  %s877_s29 = int_to_ptr.vmem [resolvable:$true] %s501_s29 }
  0x14   : > { %s667_s10 = scalar_lea.vmem (!%p212_p10), %s877_s29, 256 }
  0x15   : > { %272 = vperm.xlu0 (!%p212_p10), %664, %v259_v4   ;;  %282 = vperm.xlu1 (!%p212_p10), %665, %v261_v5   ;;  %p668_p12 = scmp.ne.s32.totalorder (!%p212_p10), %s877_s29, %s667_s10 }
  0x16   : > { %s245_s9 = scalar_select %p244_p11, %s737_s21, 1 }
  0x17   : > { %p669_p13 = pnand %p668_p12, %p820_p4 }
  0x18   : > { %s597_s12 = sshll.u32 %s245_s9, 3 }
  0x19   : > { %s251_s25 = scalar_lea.vmem %s922_s0, %s597_s12  ;;  %404 = vperm.xlu0 %664, %v263_v9   ;;  %p670_p0 = pneg %p669_p13 }
  0x1a   : > { %v264_v6 = vld [vmem:[%s251_s25] sm:$0xff]  ;;  %s598_s25 = sshll.u32 %s737_s21, 8  ;;  %s485_s21 = scalar_lea.sflag [#allocation3], %s240_s17 }
  0x1b   : > { %v286_v7 = vcombine.high %v264_v6, %v264_v6  ;;  %s875_s9 = scalar_lea.hbm %s927_s5, %s598_s25  ;;  %s671_s12 = sshll.u32 %s749_s11, 4  ;;  %s672_s12 = int_to_ptr.vmem [resolvable:$false] %s671_s12 }
  0x1c   : > { %s673_s13 = scalar_lea.vmem %s672_s12, 512  ;;  %p674_p1 = scmp.lt.s32.totalorder %s877_s29, %s672_s12 }
  0x1d   : > { %585 = vmatprep.subr.msk.mxu0 %vm300_vm0, %v286_v7  ;;  %p675_p2 = scmp.lt.s32.totalorder %s673_s13, %s667_s10 }
  0x1e   : > { %586 = vmatpush1.msk.msra.mxu0 %vm300_vm0, %v264_v6 }
  0x1f   : > { %587 = vmatmul.mubr.msk.f32.vlgmr.msra.gmra.mrb[0].mxu0 %vm287_vm1, %v254_v8  ;;  %p676_p3 = por %p675_p2, %p674_p1 }
  0x20   : > { %375 = vmatprep.mubr.f32.mxu0 %v747_v0 }
  0x21   : > { %p677_p5 = pnand %p676_p3, %p670_p0 }
  0x23   : > { %588 = vmatmul.mubr.msk.f32.gmra.mrb[2].mxu0 %vm287_vm1, %v255_v10 }
  0x24   : > { %381 = vmatprep.mubr.f32.mxu0 %v747_v0 }
  0x27   : > { %589 = vmatmul.mubr.msk.f32.gmra.mrb[4].mxu0 %vm287_vm1, %v256_v11 }
  0x28   : > { %387 = vmatprep.mubr.f32.mxu0 %v747_v0 }
  0x2b   : > { %590 = vmatmul.mubr.msk.f32.gmra.mrb[6].mxu0 %vm287_vm1, %v257_v12 }
  0x90   : > { %v268_v13 = vpop.permute.xlu0 %267  ;;  %v278_v22 = vpop.permute.xlu1 %277 }
  0x94   : > { %v273_v17 = vpop.permute.xlu0 %272  ;;  %v283_v33 = vpop.permute.xlu1 %282 }
  0x98   : > { %v405_v46 = vpop.permute.xlu0 %404 }
  0xf2   : > { %v371_v14 = vpop.f32.mrb[0].mxu0 }
  0xf3   : > { %v373_v15 = vpop.f32.mrb[1].mxu0  ;;  %v372_v16 = vadd.f32 %v371_v14, %v268_v13 }
  0xf4   : > { %v374_v18 = vadd.f32 %v373_v15, %v268_v13 }
  0xf5   : > { %v394_v24 = vmax.f32 %v372_v16, 0.0 }
  0xf6   : > { %v377_v19 = vpop.f32.mrb[2].mxu0  ;;  %v395_v26 = vmax.f32 %v374_v18, 0.0 }
  0xf7   : > { %v378_v20 = vadd.f32 %v377_v19, %v273_v17  ;;  %v379_v21 = vpop.f32.mrb[3].mxu0 }
  0xf8   : > { %v380_v23 = vadd.f32 %v379_v21, %v273_v17 }
  0xf9   : > { %v396_v25 = vmax.f32 %v378_v20, 0.0 }
  0xfa   : > { %v397_v27 = vmax.f32 %v380_v23, 0.0  ;;  %v383_v28 = vpop.f32.mrb[4].mxu0 }
  0xfb   : > { %v385_v29 = vpop.f32.mrb[5].mxu0  ;;  %v601_v30 = vpack.c.bf16 %v396_v25, %v394_v24  ;;  %v384_v32 = vadd.f32 %v383_v28, %v278_v22 }
  0xfc   : > { %v599_v31 = vpack.c.bf16 %v397_v27, %v395_v26  ;;  %v386_v34 = vadd.f32 %v385_v29, %v278_v22 }
  0xfd   : > { %v398_v39 = vmax.f32 %v384_v32, 0.0 }
  0xfe   : > { %v389_v35 = vpop.f32.mrb[6].mxu0  ;;  %600 = vmatprep.subr.bf16.mxu1 %v599_v31  ;;  %v399_v41 = vmax.f32 %v386_v34, 0.0 }
  0xff   : > { %v390_v36 = vadd.f32 %v389_v35, %v283_v33  ;;  %v391_v37 = vpop.f32.mrb[7].mxu0  ;;  %602 = vmatpush1.bf16.msra.mxu1 %v601_v30 }
 0x100   : > { %v392_v38 = vadd.f32 %v391_v37, %v283_v33 }
 0x101   : > { %v400_v40 = vmax.f32 %v390_v36, 0.0 }
 0x102   : > { %v401_v42 = vmax.f32 %v392_v38, 0.0 }
 0x103   : > { %v605_v43 = vpack.c.bf16 %v400_v40, %v398_v39 }
 0x104   : > { %v603_v44 = vpack.c.bf16 %v401_v42, %v399_v41 }
 0x106   : > { %604 = vmatprep.subr.bf16.mxu1 %v603_v44 }
 0x107   : > { %606 = vmatpush1.bf16.msra.mxu1 %v605_v43 }
 0x10a   : > { %591 = vmatmul.mubr.msk.f32.vlgmr.msra.gmra.mrb[0].mxu1 %vm407_vm2, %v262_v45 }
 0x1dd   : > { %v477_v47 = vpop.f32.mrb[0].mxu1 }
 0x1de   : > { %v478_v48 = vadd.f32 %v477_v47, %v405_v46  ;;  %v479_v49 = vpop.f32.mrb[1].mxu1 }
 0x1df   : > { %v480_v50 = vadd.f32 %v479_v49, %v405_v46 }
 0x1e0   : > { %482 = vst [vmem:[%s242_s27] sm:$0xff] %v478_v48 }
 0x1e1   : > { %483 = vst [vmem:[%s242_s27 + $0x8] sm:$0xff] %v480_v50 }
 0x1e2   : > { %680 = shalt.err (!%p677_p5)
}
 0x1e3   : > { %s681_s14 = scalar_lea.hbm %s875_s9, 256  ;;  %s685_s17 = scalar_lea.hbm %s927_s5, 512 }
 0x1e4   : > { %p682_p6 = scmp.ne.s32.totalorder %s875_s9, %s681_s14  ;;  %p686_p10 = scmp.lt.u32.totalorder %s875_s9, %s927_s5 }
 0x1e5   : > { %p687_p11 = scmp.lt.u32.totalorder %s685_s17, %s681_s14  ;;  %p689_p13 = scmp.lt.u32.totalorder %s681_s14, %s875_s9 }
 0x1e6   : > { %p683_p7 = pnand %p682_p6, %p820_p4 }
 0x1e7   : > { %p688_p12 = por %p687_p11, %p686_p10 }
 0x1e8   : > { %p684_p9 = pneg %p683_p7 }
 0x1e9   : > { %p690_p0 = por %p689_p13, %p688_p12 }
 0x1eb   : > { %p691_p1 = pnand %p690_p0, %p684_p9 }
 0x1ed   : > { %694 = shalt.err (!%p691_p1)
}
 0x1ee   : > { %607 = dma.vmem_to_hbm [thread:$0]  (%p820_p4), %s877_s29, 256, %s875_s9, %s485_s21  }
 0x1ef PF: > { %p613_p2 = scmp.ge.s32.totalorder %s745_s23, 2  ;;  %s513_s27 = sand.u32 1, %s725_s18  }
 0x1f0   : > { %s514_s7 = scalar_lea.sflag [#allocation3], %s513_s27 }
 0x1f1   : > { %p610_p3 = pnand %p613_p2, %p827_p8 }
 0x1f3   : > { %720 = dma.done.wait (!%p610_p3), %s514_s7, 256  }
 0x1f4   : > { %722 = vsyncadd (!%p610_p3), %s514_s7, 4294967040  ;;  %s18_s23 = sadd.s32 1, %s745_s23   ;;  %s930_s18 = smov %s729_s19 }
 0x1f5   : > { %p15_p5 = scmp.ge.s32.totalorder %s18_s23, 4   ;;  %s931_s19 = smov %s733_s20 }
 0x1f6   : > { %s932_s20 = smov %s833_s6  ;;  %s933_s21 = smov %s741_s22 }
 0x1f7   : > { %s934_s22 = smov %s936_s26  ;;  %17 = sbr.rel (!%p15_p5) target bundleno = 4 (0x4), region = 75 }
 0x1fe   :  { %519 = vsyncpa [#allocation3], 1 }
 0x1ff   :  { %521 = vsyncpa [#allocation3 + $0x1], 1 }

</bundles_post_ra>
